<compile_context>
chip_gen: v5e
topology: v5e:2x2
jax: 0.10.0
libtpu: 0.0.40
codegen_flags: <defaults>
</compile_context>

<pallas_src>
import jax
import jax.numpy as jnp
import numpy as np
from jax.experimental import pallas as pl
from jax.experimental.pallas import tpu as pltpu

LN_EPS = 1e-12


def _add_ln_kernel(x_ref, p_ref, g_ref, b_ref, o_ref):
    # x_ref: (TS, H) gathered word rows for this (tile, batch) block
    # p_ref: (TS, H) position rows for this sequence tile
    # g_ref / b_ref: (1, H) LayerNorm gamma / beta
    x = x_ref[...].astype(jnp.float32) + p_ref[...].astype(jnp.float32)   # (TS, H)
    mean = jnp.mean(x, axis=-1, keepdims=True)
    cent = x - mean
    var = jnp.mean(cent * cent, axis=-1, keepdims=True)
    y = cent * jax.lax.rsqrt(var + LN_EPS)
    y = y * g_ref[...].astype(jnp.float32) + b_ref[...].astype(jnp.float32)
    # TODO(synk): dropout omitted (module evaluated in eval/inference mode).
    o_ref[...] = y.astype(o_ref.dtype)


def _pick_seq_tile(S):
    # Largest tile that divides S and keeps the sublane axis dense (mult of 8),
    # capped at 512 (roofline-saturating, comfortably inside VMEM).
    for cand in (512, 256, 128, 64, 32, 16, 8):
        if S % cand == 0:
            return cand
    return S  # fall back to full sequence (block == full array dim is legal)


def my_embedding(input_ids, position_ids, word_table, pos_table, gamma, beta,
                 *, out_dtype=jnp.float32, seq_tile=None):
    """input_ids: (B, S) int32, position_ids: (1, S) int32,
       word_table: (V, H), pos_table: (P, H), gamma/beta: (H,) -> (B, S, H)."""
    B, S = input_ids.shape
    V, H = word_table.shape

    # --- gathers done by XLA (perf-review option 2: pre-gather, kernel = add+LN) ---
    inputs_embeds = jnp.take(word_table, input_ids.reshape(-1), axis=0,
                             mode="clip").reshape(B, S, H)            # (B, S, H)
    pos_embeds = jnp.take(pos_table, position_ids[0], axis=0,
                          mode="clip")                                # (S, H)

    gamma2d = gamma.reshape(1, H)
    beta2d = beta.reshape(1, H)

    TS = seq_tile if seq_tile is not None else _pick_seq_tile(S)
    num_tiles = S // TS
    grid = (num_tiles, B)  # sequence-tile axis outer so pos block reuses across batch

    itemsize = jnp.dtype(word_table.dtype).itemsize
    out_itemsize = jnp.dtype(out_dtype).itemsize
    bytes_accessed = (B * S * H * itemsize          # gathered word rows (read)
                      + S * H * itemsize            # position rows (read once per tile)
                      + 2 * H * 4                   # gamma / beta
                      + B * S * H * out_itemsize)   # output (write)
    cost = pl.CostEstimate(flops=8 * B * S * H,
                           transcendentals=B * S,   # one rsqrt per token row
                           bytes_accessed=bytes_accessed)

    return pl.pallas_call(
        _add_ln_kernel,
        out_shape=jax.ShapeDtypeStruct((B, S, H), out_dtype),
        grid=grid,
        in_specs=[
            # gathered word-embedding tile: (TS, H), batch dim squeezed
            pl.BlockSpec((None, TS, H), lambda j, b: (b, j, 0)),
            # position-embedding tile: constant across inner (batch) grid axis
            pl.BlockSpec((TS, H), lambda j, b: (j, 0)),
            # LayerNorm gamma / beta: constant blocks, stay resident
            pl.BlockSpec((1, H), lambda j, b: (0, 0)),
            pl.BlockSpec((1, H), lambda j, b: (0, 0)),
        ],
        out_specs=pl.BlockSpec((None, TS, H), lambda j, b: (b, j, 0)),
        compiler_params=pltpu.CompilerParams(
            dimension_semantics=("parallel", "parallel")),
        cost_estimate=cost,
    )(inputs_embeds, pos_embeds, gamma2d, beta2d)


def _reference(input_ids, position_ids, word_table, pos_table, gamma, beta):
    emb = word_table[input_ids] + pos_table[position_ids[0]][None, :, :]
    mean = emb.mean(-1, keepdims=True)
    var = ((emb - mean) ** 2).mean(-1, keepdims=True)
    y = (emb - mean) / jnp.sqrt(var + LN_EPS)
    return y * gamma + beta


if __name__ == "__main__":
    # small deterministic setup
    B, S, H = 2, 8, 32
    VOCAB, MAX_POS = 64, 16

    key = jax.random.PRNGKey(0)
    k_w, k_p, k_ids = jax.random.split(key, 3)

    word_table = jax.random.normal(k_w, (VOCAB, H), jnp.float32) * 0.02
    pos_table = jax.random.normal(k_p, (MAX_POS, H), jnp.float32) * 0.02
    gamma = jnp.ones((H,), jnp.float32)
    beta = jnp.zeros((H,), jnp.float32)

    input_ids = jax.random.randint(k_ids, (B, S), 0, VOCAB, dtype=jnp.int32)
    # position_ids default: registered buffer arange(max_pos)[:, :seq_length]
    position_ids = jnp.arange(S, dtype=jnp.int32).reshape(1, S)

    out = my_embedding(input_ids, position_ids, word_table, pos_table, gamma, beta)
    out = jax.block_until_ready(out)

    ref = _reference(input_ids, position_ids, word_table, pos_table, gamma, beta)
    np.testing.assert_allclose(np.asarray(out), np.asarray(ref), rtol=1e-5, atol=1e-5)

    print("KERNEL_OK")
</pallas_src>

<mosaic_0001>
module attributes {stable_mosaic.version = 11 : i64} {
  func.func @_add_ln_kernel(%arg0: i32, %arg1: i32, %arg2: memref<1x8x32xf32, #tpu.memory_space<vmem>>, %arg3: memref<8x32xf32, #tpu.memory_space<vmem>>, %arg4: memref<1x32xf32, #tpu.memory_space<vmem>>, %arg5: memref<1x32xf32, #tpu.memory_space<vmem>>, %arg6: memref<1x8x32xf32, #tpu.memory_space<vmem>>) attributes {dimension_semantics = [#tpu.dimension_semantics<parallel>, #tpu.dimension_semantics<parallel>], iteration_bounds = array<i64: 1, 2>, scalar_prefetch = 0 : i64, scratch_operands = 0 : i64, tpu.core_type = #tpu.core_type<tc>, window_params = [{transform_indices = @transform_0, window_bounds = array<i64: 1, 8, 32>}, {transform_indices = @transform_1, window_bounds = array<i64: 8, 32>}, {pipeline_mode = #tpu.pipeline_mode<synchronous>, transform_indices = @transform_2, window_bounds = array<i64: 1, 32>}, {pipeline_mode = #tpu.pipeline_mode<synchronous>, transform_indices = @transform_3, window_bounds = array<i64: 1, 32>}, {transform_indices = @transform_4, window_bounds = array<i64: 1, 8, 32>}]} {
    %c0 = arith.constant 0 : index
    %c0_0 = arith.constant 0 : index
    %c0_1 = arith.constant 0 : index
    %0 = vector.load %arg2[%c0, %c0_0, %c0_1] : memref<1x8x32xf32, #tpu.memory_space<vmem>>, vector<1x8x32xf32>
    %1 = vector.shape_cast %0 : vector<1x8x32xf32> to vector<8x32xf32>
    %c0_2 = arith.constant 0 : index
    %c0_3 = arith.constant 0 : index
    %2 = vector.load %arg3[%c0_2, %c0_3] : memref<8x32xf32, #tpu.memory_space<vmem>>, vector<8x32xf32>
    %3 = arith.addf %1, %2 : vector<8x32xf32>
    %cst = arith.constant dense<0.000000e+00> : vector<8xf32>
    %4 = vector.multi_reduction <add>, %3, %cst [1] : vector<8x32xf32> to vector<8xf32>
    %5 = vector.shape_cast %4 : vector<8xf32> to vector<8x1xf32>
    %cst_4 = arith.constant 3.200000e+01 : f32
    %6 = vector.broadcast %cst_4 : f32 to vector<8x1xf32>
    %7 = arith.divf %5, %6 : vector<8x1xf32>
    %8 = vector.broadcast %7 : vector<8x1xf32> to vector<8x32xf32>
    %9 = arith.subf %3, %8 : vector<8x32xf32>
    %10 = arith.mulf %9, %9 : vector<8x32xf32>
    %cst_5 = arith.constant dense<0.000000e+00> : vector<8xf32>
    %11 = vector.multi_reduction <add>, %10, %cst_5 [1] : vector<8x32xf32> to vector<8xf32>
    %12 = vector.shape_cast %11 : vector<8xf32> to vector<8x1xf32>
    %cst_6 = arith.constant 3.200000e+01 : f32
    %13 = vector.broadcast %cst_6 : f32 to vector<8x1xf32>
    %14 = arith.divf %12, %13 : vector<8x1xf32>
    %cst_7 = arith.constant 9.99999996E-13 : f32
    %15 = vector.broadcast %cst_7 : f32 to vector<8x1xf32>
    %16 = arith.addf %14, %15 : vector<8x1xf32>
    %17 = math.rsqrt %16 : vector<8x1xf32>
    %18 = vector.broadcast %17 : vector<8x1xf32> to vector<8x32xf32>
    %19 = arith.mulf %9, %18 : vector<8x32xf32>
    %c0_8 = arith.constant 0 : index
    %c0_9 = arith.constant 0 : index
    %20 = vector.load %arg4[%c0_8, %c0_9] : memref<1x32xf32, #tpu.memory_space<vmem>>, vector<1x32xf32>
    %21 = vector.broadcast %20 : vector<1x32xf32> to vector<8x32xf32>
    %22 = arith.mulf %19, %21 : vector<8x32xf32>
    %c0_10 = arith.constant 0 : index
    %c0_11 = arith.constant 0 : index
    %23 = vector.load %arg5[%c0_10, %c0_11] : memref<1x32xf32, #tpu.memory_space<vmem>>, vector<1x32xf32>
    %24 = vector.broadcast %23 : vector<1x32xf32> to vector<8x32xf32>
    %25 = arith.addf %22, %24 : vector<8x32xf32>
    %c0_12 = arith.constant 0 : index
    %c0_13 = arith.constant 0 : index
    %c0_14 = arith.constant 0 : index
    %26 = vector.load %arg6[%c0_12, %c0_13, %c0_14] : memref<1x8x32xf32, #tpu.memory_space<vmem>>, vector<1x8x32xf32>
    %27 = vector.shape_cast %26 : vector<1x8x32xf32> to vector<8x32xf32>
    %28 = vector.shape_cast %25 : vector<8x32xf32> to vector<1x8x32xf32>
    tpu.vector_store %arg6[%c0_12, %c0_13, %c0_14], %28 {strides = array<i32>} : memref<1x8x32xf32, #tpu.memory_space<vmem>>, vector<1x8x32xf32>,
    return
  }
  func.func @transform_0(%arg0: i32, %arg1: i32) -> (i32, i32, i32) {
    %c0_i32 = arith.constant 0 : i32
    %c0_i32_0 = arith.constant 0 : i32
    return %arg1, %arg0, %c0_i32 : i32, i32, i32
  }
  func.func @transform_1(%arg0: i32, %arg1: i32) -> (i32, i32) {
    %c0_i32 = arith.constant 0 : i32
    %c0_i32_0 = arith.constant 0 : i32
    return %arg0, %c0_i32 : i32, i32
  }
  func.func @transform_2(%arg0: i32, %arg1: i32) -> (i32, i32) {
    %c0_i32 = arith.constant 0 : i32
    %c0_i32_0 = arith.constant 0 : i32
    %c0_i32_1 = arith.constant 0 : i32
    return %c0_i32, %c0_i32_0 : i32, i32
  }
  func.func @transform_3(%arg0: i32, %arg1: i32) -> (i32, i32) {
    %c0_i32 = arith.constant 0 : i32
    %c0_i32_0 = arith.constant 0 : i32
    %c0_i32_1 = arith.constant 0 : i32
    return %c0_i32, %c0_i32_0 : i32, i32
  }
  func.func @transform_4(%arg0: i32, %arg1: i32) -> (i32, i32, i32) {
    %c0_i32 = arith.constant 0 : i32
    %c0_i32_0 = arith.constant 0 : i32
    return %arg1, %arg0, %c0_i32 : i32, i32, i32
  }
}

</mosaic_0001>

<bundles_post_ra>
// kernel: tpu_custom_call.1
= control target key start
LH: loop header
LB: loop body
LE: loop exit
PB: predicated region body
PF: predicated region fallthrough
CT: control target
= control target key end

     0   :  { %9 = vsyncpa [#allocation3], 0  ;;  %s839_s0 = inlined_call_operand.hbm [shape: f32[2,8,32], index: 0, kind: input, shape index: {}]   ;;  %s840_s1 = inlined_call_operand.hbm [shape: f32[8,32], index: 1, kind: input, shape index: {}]   ;;  %s841_s2 = inlined_call_operand.vmem [shape: f32[1,32], index: 2, kind: input, shape index: {}]   ;;  %s842_s3 = inlined_call_operand.vmem [shape: f32[1,32], index: 3, kind: input, shape index: {}]   ;;  %s843_s4 = inlined_call_operand.hbm [shape: f32[2,8,32], index: 4, kind: output, shape index: {}]  }
   0x1   :  { %11 = vsyncpa [#allocation3 + $0x1], 0 }
   0x2   :  { %12 = vsyncpa [#allocation6], 0 }
   0x3   :  { %13 = vsyncpa [#allocation4], 0 }
   0x4   :  { %15 = vsyncpa [#allocation4 + $0x1], 0  ;;  %s677_s15 = smov 0   ;;  %s679_s16 = smov 0  }
   0x5   :  { %s681_s17 = smov 0   ;;  %s683_s18 = smov 0  }
   0x6   :  { %s685_s19 = smov 0   ;;  %s687_s20 = smov 0  }
   0x7 LB: > { %s407_s21 = sadd.s32 4294967295, %s648_s20   ;;  %s408_s22 = sadd.s32 4294967294, %s648_s20   ;;  %s648_s20 = sphi %s687_s20, %s21_s20   ;;  %s644_s19 = sphi %s685_s19, %s855_s19   ;;  %s640_s18 = sphi %s683_s18, %s854_s18   ;;  %s636_s17 = sphi %s681_s17, %s853_s17   ;;  %s632_s16 = sphi %s679_s16, %s852_s16   ;;  %s628_s15 = sphi %s677_s15, %s851_s15  }
   0x8   : > { %p55_p0 = scmp.ne.s32.totalorder %s632_s16, %s628_s15  ;;  %p711_p1 = scmp.eq.s32.totalorder %s407_s21, 0 }
   0x9   : > { %p715_p2 = scmp.eq.s32.totalorder %s407_s21, 1  ;;  %p155_p3 = scmp.eq.s32.totalorder %s408_s22, 1 }
   0xa   : > { %p721_p4 = por %p711_p1, %p55_p0  ;;  %p409_p5 = scmp.ge.s32.totalorder %s648_s20, 1 }
   0xb   : > { %p726_p6 = por %p155_p3, %p55_p0  ;;  %p162_p7 = scmp.lt.s32.totalorder %s648_s20, 3 }
   0xc   : > { %s176_s29 = sshll.u32 %s840_s1, 4  ;;  %p411_p9 = scmp.ge.s32.totalorder %s648_s20, 2  ;;  %s177_s29 = int_to_ptr.hbm [resolvable:$true] %s176_s29 }
   0xd   : > { %p734_p8 = pnand %p409_p5, %p162_p7  ;;  %s650_s5 = smov [#allocation5]  }
   0xe   : > { %s178_s6 = sshll.u32 %s650_s5, 4  ;;  %s30_s7 = sadd.s32 1, %s644_s19  ;;  %s179_s6 = int_to_ptr.vmem [resolvable:$true] %s178_s6 }
   0xf   : > { %p430_p10 = pneg %p734_p8  ;;  %p31_p12 = scmp.ge.s32.totalorder %s30_s7, 2 }
  0x10   : > { %s42_s8 = sadd.s32 1, %s636_s17  ;;  %p49_p13 = scmp.ne.s32.totalorder %s636_s17, %s632_s16 }
  0x11   : > { %p431_p11 = pnand %p430_p10, %p711_p1  ;;  %p50_p0 = scmp.eq.s32.totalorder %s648_s20, 0 }
  0x12   : > { %s857_s7 = smov (%p31_p12, %s30_s7), 0  ;;  %p756_p5 = por %p715_p2, %p49_p13 }
  0x13   : > { %433 = dma.hbm_to_vmem [thread:$0]  (!%p431_p11), %s177_s29, 128, %s179_s6, [#allocation6]  }
  0x14   : > { %p750_p3 = por %p50_p0, %p49_p13  ;;  %s37_s11 = ssub.s32 %s644_s19, %s857_s7 }
  0x15   : > { %p443_p7 = scmp.lt.s32.totalorder %s648_s20, 2  ;;  %p40_p10 = scmp.eq.s32.totalorder %s37_s11, 0 }
  0x16   : > { %s195_s12 = sand.u32 1, %s636_s17   ;;  %s413_s21 = sshll.u32 %s644_s19, 3 }
  0x17   : > { %s412_s13 = sshll.u32 %s195_s12, 3  ;;  %s204_s28 = scalar_lea.hbm %s839_s0, %s413_s21 }
  0x18   : > { %s765_s14 = scalar_select %p40_p10, %s636_s17, %s42_s8  }
  0x19   : > { %s199_s29 = scalar_lea.vmem [#allocation2], %s412_s13  ;;  %s206_s24 = sshll.u32 %s204_s28, 4  ;;  %s207_s24 = int_to_ptr.hbm [resolvable:$true] %s206_s24 }
  0x1a   : > { %s208_s5 = sshll.u32 %s199_s29, 4  ;;  %p435_p2 = pnand %p443_p7, %p750_p3  ;;  %s209_s5 = int_to_ptr.vmem [resolvable:$true] %s208_s5 }
  0x1b   : > { %s196_s6 = scalar_lea.sflag [#allocation3], %s195_s12  ;;  %217 = sbr.rel (%p734_p8) target bundleno = 309 (0x135), region = 36 }
  0x1c   : > { %437 = dma.hbm_to_vmem [thread:$0]  (!%p435_p2), %s207_s24, 128, %s209_s5, %s196_s6  }
  0x1d   : > { %s776_s8 = sand.u32 (!%p734_p8), 1, %s632_s16  }
  0x1e   : > { %s415_s11 = sshll.u32 (!%p734_p8), %s776_s8, 3  ;;  %s220_s13 = scalar_lea.sflag (!%p734_p8), [#allocation3], %s776_s8 }
  0x1f   : > { %s223_s21 = scalar_lea.vmem (!%p734_p8), [#allocation2], %s415_s11 }
  0x20   : > { %615 = dma.done.wait (%p721_p4), %s220_s13, 128  }
  0x21   : > { %617 = vsyncadd (%p721_p4), %s220_s13, 4294967168 }
  0x22   : > { %619 = dma.done.wait (%p711_p1), [#allocation6], 128  }
  0x23   : > { %621 = vsyncadd (%p711_p1), [#allocation6], 4294967168  ;;  %v254_v0 = vld [vmem:[%s223_s21] sm:$0xff]  ;;  %v255_v1 = vld [vmem:[#allocation5] sm:$0xff]  ;;  %vm257_vm0 = vcmask 261120   ;;  %v651_v4 = vmov 32.0  }
  0x24   : > { %v256_v2 = vadd.f32 %v255_v1, %v254_v0  ;;  %498 = vrcp.f32 %v651_v4  ;;  %s419_s23 = sshll.u32 %s640_s18, 3  ;;  %v496_v25 = vld [vmem:[%s841_s2] ss:$0 sm:$0xff]  ;;  %s253_s18 = scalar_lea.vmem [#allocation7], %s415_s11 }
  0x25   : > { %s310_s22 = scalar_lea.hbm %s843_s4, %s419_s23  ;;  %v497_v28 = vld [vmem:[%s842_s3] ss:$0 sm:$0xff]  ;;  %s312_s29 = sshll.u32 %s253_s18, 4  ;;  %s313_s29 = int_to_ptr.vmem [resolvable:$true] %s312_s29 }
  0x26   : > { %v258_v3 = vsel %vm257_vm0, %v256_v2, 0.0  ;;  %s314_s5 = sshll.u32 %s310_s22, 4  ;;  %s299_s24 = scalar_lea.sflag [#allocation4], %s776_s8  ;;  %s315_s5 = int_to_ptr.hbm [resolvable:$true] %s314_s5 }
  0x27   : > { %259 = vadd.xlane.f32.xlu0 %v258_v3  ;;  %s576_s6 = sshra.s32 %s315_s5, 4  ;;  %s582_s11 = scalar_lea.hbm %s843_s4, 16  ;;  %s577_s6 = int_to_ptr.hbm [resolvable:$true] %s576_s6 }
  0x28   : > { %s578_s13 = scalar_lea.hbm %s577_s6, 8  ;;  %p583_p11 = scmp.lt.s32.totalorder %s577_s6, %s843_s4 }
  0x29   : > { %p579_p1 = scmp.ne.s32.totalorder %s577_s6, %s578_s13  ;;  %p584_p12 = scmp.lt.s32.totalorder %s582_s11, %s578_s13 }
  0x2a   : > { %v499_v5 = vpop.eup %498 }
  0x2b   : > { %v262_v6 = vmul.f32 32.0, %v499_v5  ;;  %vm266_vm1 = vweird.f32 %v499_v5  ;;  %p580_p4 = pnand %p579_p1, %p756_p5  ;;  %p585_p13 = por %p584_p12, %p583_p11 }
  0x2d   : > { %v263_v7 = vsub.f32 1.0, %v262_v6  ;;  %p581_p8 = pneg %p580_p4 }
  0x2f   : > { %v264_v8 = vmul.f32 %v499_v5, %v263_v7  ;;  %p586_p0 = pnand %p585_p13, %p581_p8 }
  0x31   : > { %v265_v9 = vadd.f32 %v499_v5, %v264_v8 }
  0x33   : > { %v267_v10 = vsel %vm266_vm1, %v499_v5, %v265_v9 }
  0x9a   : > { %v260_v11 = vpop.xlane.xlu0 %259 }
  0x9b   : > { %v268_v12 = vmul.f32 %v267_v10, %v260_v11 }
  0x9d   : > { %v269_v13 = vsub.f32 %v256_v2, %v268_v12 }
  0x9f   : > { %v270_v14 = vmul.f32 %v269_v13, %v269_v13 }
  0xa1   : > { %v271_v15 = vsel %vm257_vm0, %v270_v14, 0.0 }
  0xa2   : > { %272 = vadd.xlane.f32.xlu0 %v271_v15 }
 0x115   : > { %v273_v16 = vpop.xlane.xlu0 %272 }
 0x116   : > { %v274_v17 = vmul.f32 %v273_v16, %v267_v10 }
 0x118   : > { %v275_v18 = vadd.f32 1e-12, %v274_v17 }
 0x11a   : > { %500 = vrsqrt.f32 %v275_v18  ;;  %vm282_vm3 = vweird.f32 %v275_v18 }
 0x120   : > { %v501_v19 = vpop.eup %500 }
 0x121   : > { %v277_v20 = vmul.f32 %v501_v19, %v275_v18  ;;  %vm283_vm2 = vweird.f32 %v501_v19 }
 0x122   : > { %vm284_vm4 = vmor %vm282_vm3, %vm283_vm2 }
 0x123   : > { %v278_v21 = vmul.f32 %v501_v19, %v277_v20 }
 0x125   : > { %v279_v22 = vmul.f32 0.5, %v278_v21 }
 0x127   : > { %v280_v23 = vsub.f32 1.5, %v279_v22 }
 0x129   : > { %v281_v24 = vmul.f32 %v501_v19, %v280_v23 }
 0x12b   : > { %v285_v26 = vsel %vm284_vm4, %v501_v19, %v281_v24 }
 0x12c   : > { %v286_v27 = vmul.f32 %v285_v26, %v269_v13 }
 0x12e   : > { %v291_v29 = vmul.f32 %v496_v25, %v286_v27 }
 0x130   : > { %v296_v30 = vadd.f32 %v497_v28, %v291_v29 }
 0x132   : > { %297 = vst.msk [vmem:[%s253_s18] sm:$0xff] %vm257_vm0, %v296_v30 }
 0x133   : > { %589 = shalt.err (!%p586_p0)
}
 0x134   : > { %428 = dma.vmem_to_hbm [thread:$0]  (%p756_p5), %s313_s29, 128, %s315_s5, %s299_s24  }
 0x135 PF: > { %s326_s8 = sand.u32 1, %s628_s15   ;;  %p439_p3 = pnand %p411_p9, %p726_p6 }
 0x136   : > { %s327_s9 = scalar_lea.sflag [#allocation4], %s326_s8 }
 0x137   : > { %p440_p7 = pneg %p439_p3 }
 0x139   : > { %623 = dma.done.wait (%p440_p7), %s327_s9, 128  }
 0x13a   : > { %625 = vsyncadd (%p440_p7), %s327_s9, 4294967168  ;;  %s21_s20 = sadd.s32 1, %s648_s20   ;;  %s851_s15 = smov %s632_s16 }
 0x13b   : > { %p18_p10 = scmp.ge.s32.totalorder %s21_s20, 4   ;;  %s852_s16 = smov %s636_s17 }
 0x13c   : > { %s853_s17 = smov %s765_s14  ;;  %s854_s18 = smov %s644_s19 }
 0x13d   : > { %s855_s19 = smov %s857_s7  ;;  %20 = sbr.rel (!%p18_p10) target bundleno = 7 (0x7), region = 86 }
 0x142   :  { %333 = vsyncpa [#allocation3], 1 }
 0x143   :  { %335 = vsyncpa [#allocation3 + $0x1], 1 }
 0x144   :  { %336 = vsyncpa [#allocation6], 1 }
 0x145   :  { %337 = vsyncpa [#allocation4], 1 }
 0x146   :  { %339 = vsyncpa [#allocation4 + $0x1], 1 }

</bundles_post_ra>
